<compile_context>
chip_gen: v6e
topology: v6e:2x2x1
jax: 0.10.0
libtpu: 0.0.40
codegen_flags: <defaults>
</compile_context>

<pallas_src>
import functools
import math

import jax
import jax.numpy as jnp
from jax.experimental import pallas as pl
from jax.experimental.pallas import tpu as pltpu


# -----------------------------------------------------------------------------
# Parameter setup (matches the PyTorch __init__); used here only to build the
# pure-JAX reference.  Cast once at construction (review item 1).
# -----------------------------------------------------------------------------
def make_pe_table(d_model, max_len=5000, dtype=jnp.float32):
    """pe buffer of shape (max_len, 1, d_model)."""
    position = jnp.arange(0, max_len, dtype=jnp.float32)[:, None]
    div_term = jnp.exp(jnp.arange(0, d_model, 2, dtype=jnp.float32)
                       * (-math.log(10000.0) / d_model))
    angles = position * div_term
    pe = jnp.zeros((max_len, d_model), dtype=jnp.float32)
    pe = pe.at[:, 0::2].set(jnp.sin(angles))
    pe = pe.at[:, 1::2].set(jnp.cos(angles))
    return pe[:, None, :].astype(dtype)


def _make_column_params(d_model, batch):
    """(2, batch*d_model) f32: row 0 = inv_freq per column, row 1 = phase.

    Column c of the flattened (S, B*D) activation is feature c % d_model.
    pe[pos, f] = sin(pos * inv_freq[f] + phase[f]) with phase 0 for even f
    (sin) and pi/2 for odd f (cos == sin(x + pi/2)) -- identical math to the
    registered torch buffer.
    """
    feat = jnp.arange(d_model, dtype=jnp.float32)
    parity = jnp.mod(feat, 2.0)
    inv_freq = jnp.exp((feat - parity) * (-math.log(10000.0) / d_model))
    phase = parity * (math.pi / 2.0)
    params = jnp.stack([inv_freq, phase], axis=0)          # (2, D)
    return jnp.tile(params, (1, batch))                    # (2, B*D)


# -----------------------------------------------------------------------------
# Portable counter-based hash (dropout PRNG).  int32 wrapping arithmetic only.
# -----------------------------------------------------------------------------
def _to_i32(v):
    v &= 0xFFFFFFFF
    return v - (1 << 32) if v >= (1 << 31) else v


_HASH_M1 = _to_i32(0x7FEB352D)      # lowbias32 multipliers (as signed int32)
_HASH_M2 = _to_i32(0x846CA68B)


def _srl(x, n):
    """Logical right shift on int32 arrays."""
    return jax.lax.shift_right_logical(x, jnp.full_like(x, n))


def _mix_seed(seed):
    """Pre-hash the user seed into a well-mixed 32-bit salt (runs outside the
    kernel, plain XLA), returned as a (1,) int32 array for SMEM."""
    s = jnp.asarray(seed).astype(jnp.uint32)
    s = s * jnp.uint32(0x9E3779B9)
    s = (s ^ (s >> jnp.uint32(16))) * jnp.uint32(0x85EBCA6B)
    s = (s ^ (s >> jnp.uint32(13))) * jnp.uint32(0xC2B2AE35)
    s = s ^ (s >> jnp.uint32(16))
    return jax.lax.bitcast_convert_type(s, jnp.int32).reshape((1,))


# -----------------------------------------------------------------------------
# Kernels.  Blocks are 2D (seq_tile, B*D); pe generated in-kernel.
# -----------------------------------------------------------------------------
def pe_add_kernel(params_ref, x_ref, o_ref, *, seq_tile):
    ts, n = x_ref.shape
    row = jax.lax.broadcasted_iota(jnp.int32, (ts, n), 0)
    pos = (pl.program_id(0) * seq_tile + row).astype(jnp.float32)
    params = params_ref[...]                               # (2, n) f32
    pe = jnp.sin(pos * params[0:1, :] + params[1:2, :])
    o_ref[...] = (x_ref[...] + pe.astype(x_ref.dtype)).astype(o_ref.dtype)


def pe_add_dropout_kernel(salt_ref, params_ref, x_ref, o_ref, *, seq_tile,
                          keep_threshold, scale):
    # Fused positional-encoding add + inverted dropout (train mode).
    # TODO(synk): the mask stream cannot bit-match torch's dropout RNG.
    ts, n = x_ref.shape
    row = jax.lax.broadcasted_iota(jnp.int32, (ts, n), 0)
    col = jax.lax.broadcasted_iota(jnp.int32, (ts, n), 1)
    glob_row = pl.program_id(0) * seq_tile + row           # global seq position

    params = params_ref[...]                               # (2, n) f32
    pe = jnp.sin(glob_row.astype(jnp.float32) * params[0:1, :] + params[1:2, :])
    y = x_ref[...] + pe.astype(x_ref.dtype)                # stays in x's dtype

    salt = salt_ref[0]                                     # pre-mixed seed salt
    h = (glob_row * n + col) ^ salt                        # global element id
    h = (h ^ _srl(h, 16)) * _HASH_M1
    h = h + salt
    h = (h ^ _srl(h, 15)) * _HASH_M2
    h = h ^ _srl(h, 16)
    # Top 24 hash bits ~ uniform in [0, 2^24); P(keep) = 1 - rate (to 2^-24).
    keep = _srl(h, 8) >= keep_threshold
    o_ref[...] = jnp.where(keep, y * scale, jnp.zeros_like(y)).astype(o_ref.dtype)


# -----------------------------------------------------------------------------
# Tile / VMEM planning (generation-aware, review items 3/4/5/8).
# -----------------------------------------------------------------------------
def _vmem_plan():
    """Return (block_budget_bytes, vmem_limit_bytes)."""
    phys = 64 * 1024 * 1024                       # conservative (v7x physical)
    try:
        if jax.devices()[0].platform == "tpu":
            info = pltpu.get_tpu_info()
            phys = int(getattr(info, "vmem_capacity_bytes", phys))
    except Exception:
        pass
    if phys >= 128 * 1024 * 1024:                 # v5e / v6e
        return 24 * 1024 * 1024, 64 * 1024 * 1024
    return 12 * 1024 * 1024, 32 * 1024 * 1024     # v7x-safe default


def _choose_seq_tile(S, N, itemsize, block_budget_bytes):
    """Biggest sublane-aligned seq tile within the VMEM budget, but keep >= ~6
    blocks so megacore parts still get >=3 pipelined blocks per TensorCore."""
    sublane = max(8, 32 // itemsize)              # 8 f32, 16 bf16, 32 int8/fp8
    if S <= sublane:
        return S                                   # single full-extent block
    per_row = 4 * N * itemsize                     # x + out, double-buffered
    ts = max(sublane, block_budget_bytes // per_row)
    min_blocks = 6
    if ts * min_blocks > S:
        ts = -(-S // min_blocks)
    ts = max(sublane, (ts // sublane) * sublane)
    return int(min(ts, S))


# -----------------------------------------------------------------------------
# Wrapper.
# -----------------------------------------------------------------------------
def positional_encoding_forward(x, *, dropout_rate=0.1, deterministic=True,
                                rng_seed=0, seq_tile=None, alias_input=False):
    """Forward of PositionalEncoding: dropout(x + pe[:S]).

    x: (S, B, D) seq-first activations.  pe is generated in-kernel
    (mathematically identical to the registered buffer), so no pe table is
    streamed from HBM.  Set alias_input=True only if the caller donates x.
    """
    S, B, D = x.shape
    assert D % 2 == 0, "d_model must be even (same constraint as the torch code)"
    assert 0.0 <= dropout_rate < 1.0
    N = B * D
    x2d = x.reshape(S, N)                          # free row-major reshape
    col_params = _make_column_params(D, B)         # (2, N) f32, tiny

    block_budget, vmem_limit = _vmem_plan()
    ts = int(seq_tile) if seq_tile else _choose_seq_tile(
        S, N, x.dtype.itemsize, block_budget)
    grid = (pl.cdiv(S, ts),)                       # partial tail block is fine

    params_spec = pl.BlockSpec((2, N), lambda i: (0, 0))
    x_spec = pl.BlockSpec((ts, N), lambda i: (i, 0))
    out_spec = pl.BlockSpec((ts, N), lambda i: (i, 0))
    out_shape = jax.ShapeDtypeStruct((S, N), x.dtype)
    compiler_params = pltpu.CompilerParams(
        dimension_semantics=("parallel",),
        vmem_limit_bytes=vmem_limit,
    )

    use_dropout = (not deterministic) and dropout_rate > 0.0
    if not use_dropout:
        out2d = pl.pallas_call(
            functools.partial(pe_add_kernel, seq_tile=ts),
            out_shape=out_shape,
            grid=grid,
            in_specs=[params_spec, x_spec],
            out_specs=out_spec,
            compiler_params=compiler_params,
            input_output_aliases={1: 0} if alias_input else {},
        )(col_params, x2d)
    else:
        salt = _mix_seed(rng_seed)                 # (1,) int32
        keep_threshold = min(int(dropout_rate * (1 << 24)), (1 << 24) - 1)
        scale = 1.0 / (1.0 - float(dropout_rate))
        out2d = pl.pallas_call(
            functools.partial(pe_add_dropout_kernel, seq_tile=ts,
                              keep_threshold=keep_threshold, scale=scale),
            out_shape=out_shape,
            grid=grid,
            in_specs=[pl.BlockSpec(memory_space=pltpu.MemorySpace.SMEM),
                      params_spec, x_spec],
            out_specs=out_spec,
            compiler_params=compiler_params,
            input_output_aliases={2: 0} if alias_input else {},
        )(salt, col_params, x2d)
    return out2d.reshape(S, B, D)


# -----------------------------------------------------------------------------
# Demo / correctness check.
# -----------------------------------------------------------------------------
if __name__ == "__main__":
    d_model = 32
    seq_len = 32
    batch = 2
    dropout_rate = 0.1

    key = jax.random.PRNGKey(0)
    x = jax.random.normal(key, (seq_len, batch, d_model), dtype=jnp.float32)

    pe = make_pe_table(d_model)                    # reference buffer (max_len=5000)
    ref = x + pe[:seq_len]                         # pure-JAX eval-mode forward

    # --- eval mode (dropout = identity), matches model.eval() ----------------
    out = positional_encoding_forward(x, dropout_rate=dropout_rate,
                                      deterministic=True)
    out = jax.block_until_ready(out)
    assert out.shape == (seq_len, batch, d_model)
    assert jnp.allclose(out, ref, atol=1e-4, rtol=1e-5), "eval-mode mismatch"

    # --- train mode: fused in-kernel dropout ----------------------------------
    out_tr = positional_encoding_forward(x, dropout_rate=dropout_rate,
                                         deterministic=False, rng_seed=1234)
    out_tr = jax.block_until_ready(out_tr)
    scale = 1.0 / (1.0 - dropout_rate)
    kept_ok = jnp.isclose(out_tr, ref * scale, atol=1e-4, rtol=1e-4)
    dropped = out_tr == 0.0
    assert bool(jnp.all(kept_ok | dropped)), "train-mode values mismatch"
    drop_frac = float(jnp.mean(dropped.astype(jnp.float32)))
    assert 0.0 < drop_frac < 0.5, f"implausible dropout fraction {drop_frac}"

    print("KERNEL_OK")
</pallas_src>

<mosaic_0001>
module attributes {stable_mosaic.version = 11 : i64} {
  func.func @pe_add_kernel(%arg0: i32, %arg1: memref<2x64xf32, #tpu.memory_space<vmem>>, %arg2: memref<8x64xf32, #tpu.memory_space<vmem>>, %arg3: memref<8x64xf32, #tpu.memory_space<vmem>>) attributes {dimension_semantics = [#tpu.dimension_semantics<parallel>], iteration_bounds = array<i64: 4>, scalar_prefetch = 0 : i64, scratch_operands = 0 : i64, tpu.core_type = #tpu.core_type<tc>, window_params = [{pipeline_mode = #tpu.pipeline_mode<synchronous>, transform_indices = @transform_0, window_bounds = array<i64: 2, 64>}, {transform_indices = @transform_1, window_bounds = array<i64: 8, 64>}, {transform_indices = @transform_2, window_bounds = array<i64: 8, 64>}]} {
    %0 = tpu.iota {dimensions = array<i32: 0>} : vector<8x64xi32>
    %c8_i32 = arith.constant 8 : i32
    %1 = arith.muli %arg0, %c8_i32 : i32
    %2 = vector.broadcast %1 : i32 to vector<8x64xi32>
    %3 = arith.addi %2, %0 : vector<8x64xi32>
    %4 = arith.sitofp %3 : vector<8x64xi32> to vector<8x64xf32>
    %c0 = arith.constant 0 : index
    %c0_0 = arith.constant 0 : index
    %5 = vector.load %arg1[%c0, %c0_0] : memref<2x64xf32, #tpu.memory_space<vmem>>, vector<2x64xf32>
    %6 = vector.extract_strided_slice %5 {offsets = [0, 0], sizes = [1, 64], strides = [1, 1]} : vector<2x64xf32> to vector<1x64xf32>
    %7 = vector.broadcast %6 : vector<1x64xf32> to vector<8x64xf32>
    %8 = arith.mulf %4, %7 : vector<8x64xf32>
    %9 = vector.extract_strided_slice %5 {offsets = [1, 0], sizes = [1, 64], strides = [1, 1]} : vector<2x64xf32> to vector<1x64xf32>
    %10 = vector.broadcast %9 : vector<1x64xf32> to vector<8x64xf32>
    %11 = arith.addf %8, %10 : vector<8x64xf32>
    %12 = math.sin %11 : vector<8x64xf32>
    %c0_1 = arith.constant 0 : index
    %c0_2 = arith.constant 0 : index
    %13 = vector.load %arg2[%c0_1, %c0_2] : memref<8x64xf32, #tpu.memory_space<vmem>>, vector<8x64xf32>
    %14 = arith.addf %13, %12 : vector<8x64xf32>
    %c0_3 = arith.constant 0 : index
    %c0_4 = arith.constant 0 : index
    %15 = vector.load %arg3[%c0_3, %c0_4] : memref<8x64xf32, #tpu.memory_space<vmem>>, vector<8x64xf32>
    tpu.vector_store %arg3[%c0_3, %c0_4], %14 {strides = array<i32>} : memref<8x64xf32, #tpu.memory_space<vmem>>, vector<8x64xf32>,
    return
  }
  func.func @transform_0(%arg0: i32) -> (i32, i32) {
    %c0_i32 = arith.constant 0 : i32
    %c0_i32_0 = arith.constant 0 : i32
    %c0_i32_1 = arith.constant 0 : i32
    return %c0_i32, %c0_i32_0 : i32, i32
  }
  func.func @transform_1(%arg0: i32) -> (i32, i32) {
    %c0_i32 = arith.constant 0 : i32
    %c0_i32_0 = arith.constant 0 : i32
    return %arg0, %c0_i32 : i32, i32
  }
  func.func @transform_2(%arg0: i32) -> (i32, i32) {
    %c0_i32 = arith.constant 0 : i32
    %c0_i32_0 = arith.constant 0 : i32
    return %arg0, %c0_i32 : i32, i32
  }
}

</mosaic_0001>

<bundles_post_ra>
// kernel: tpu_custom_call.1
= control target key start
LH: loop header
LB: loop body
LE: loop exit
PB: predicated region body
PF: predicated region fallthrough
CT: control target
= control target key end

     0   :  { %7 = vsyncpa [#allocation3], 0  ;;  %s830_s0 = inlined_call_operand.hbm [shape: f32[2,64], index: 0, kind: input, shape index: {}]   ;;  %s831_s1 = inlined_call_operand.hbm [shape: f32[32,64], index: 1, kind: input, shape index: {}]   ;;  %s832_s2 = inlined_call_operand.hbm [shape: f32[32,64], index: 2, kind: output, shape index: {}]  }
   0x1   :  { %8 = vsyncpa [#allocation6], 0 }
   0x2   :  { %10 = vsyncpa [#allocation6 + $0x1], 0 }
   0x3   :  { %11 = vsyncpa [#allocation4], 0 }
   0x4   :  { %13 = vsyncpa [#allocation4 + $0x1], 0  ;;  %s631_s9 = smov 0   ;;  %s633_s10 = smov 0  }
   0x5   :  { %s635_s11 = smov 0   ;;  %s637_s12 = smov 0  }
   0x6 LB: > { %s652_s13 = sadd.s32 4294967295, %s605_s12   ;;  %s393_s14 = sadd.s32 4294967294, %s605_s12   ;;  %s605_s12 = sphi %s637_s12, %s854_s12   ;;  %s601_s11 = sphi %s635_s11, %s853_s11   ;;  %s597_s10 = sphi %s633_s10, %s852_s10   ;;  %s593_s9 = sphi %s631_s9, %s851_s9  }
   0x7   : > { %p60_p0 = scmp.ne.s32.totalorder %s597_s10, %s593_s9  ;;  %p833_p1 = scmp.eq.s32.totalorder %s652_s13, 0 }
   0x8   : > { %p90_p3 = scmp.eq.s32.totalorder %s393_s14, 3  ;;  %p394_p5 = scmp.ge.s32.totalorder %s605_s12, 1 }
   0x9   : > { %p661_p4 = por %p833_p1, %p60_p0  ;;  %p97_p7 = scmp.lt.s32.totalorder %s605_s12, 5 }
   0xa   : > { %p666_p6 = por %p90_p3, %p60_p0  ;;  %s607_s18 = smov [#allocation2]  }
   0xb   : > { %s837_s15 = scalar_select %p661_p4, 1, 0 }
   0xc   : > { %s838_s16 = scalar_select %p666_p6, 1, 0 }
   0xd   : > { %p671_p8 = pnand %p394_p5, %p97_p7  ;;  %s110_s19 = sshll.u32 %s607_s18, 4  ;;  %s111_s19 = int_to_ptr.vmem [resolvable:$true] %s110_s19 }
   0xe   : > { %s678_s20 = sadd.s32 1, %s605_s12   ;;  %s47_s24 = sadd.s32 1, %s601_s11 }
   0xf   : > { %s839_s17 = scalar_select %p671_p8, 1, 0 }
  0x10   : > { %p424_p9 = pneg %p671_p8  ;;  %s44_s22 = ssub.s32 %s605_s12, %s678_s20 }
  0x11   : > { %p688_p11 = scmp.eq.s32.totalorder %s44_s22, 0  ;;  %p54_p12 = scmp.ne.s32.totalorder %s601_s11, %s597_s10 }
  0x12   : > { %p682_p10 = pnand %p424_p9, %p833_p1  ;;  %s494_s25 = scalar_lea.vmem %s111_s19, 32 }
  0x13   : > { %p495_p0 = scmp.ne.s32.totalorder %s111_s19, %s494_s25  ;;  %p502_p7 = scmp.lt.s32.totalorder %s111_s19, %s111_s19 }
  0x14   : > { %p485_p13 = pneg %p682_p10  ;;  %p503_p2 = scmp.lt.s32.totalorder %s494_s25, %s494_s25 }
  0x16   : > { %p497_p3 = pnand %p495_p0, %p485_p13  ;;  %p504_p9 = por %p503_p2, %p502_p7 }
  0x18   : > { %p498_p5 = pneg %p497_p3 }
  0x1a   : > { %p505_p1 = pnand %p504_p9, %p498_p5 }
  0x1c   : > { %508 = shalt.err (!%p505_p1)
}
  0x1d   : > { %427 = dma.hbm_to_vmem [thread:$0]  (!%p682_p10), %s830_s0, 32, %s111_s19, [#allocation3]  }
  0x1e   : > { %s705_s28 = scalar_select %p688_p11, %s601_s11, %s47_s24  }
  0x1f   : > { %p55_p1 = scmp.eq.s32.totalorder %s605_s12, 0  ;;  %p842_p2 = scmp.eq.s32.totalorder %s652_s13, 3 }
  0x20   : > { %p437_p0 = scmp.lt.s32.totalorder %s605_s12, 4  ;;  %s121_s30 = sand.u32 1, %s601_s11  }
  0x21   : > { %p713_p13 = por %p842_p2, %p54_p12  ;;  %p56_p3 = por %p55_p1, %p54_p12 }
  0x22   : > { %s397_s3 = sshll.u32 %s121_s30, 3  ;;  %s398_s4 = sshll.u32 %s605_s12, 7 }
  0x23   : > { %s843_s29 = scalar_select %p713_p13, 1, 0 }
  0x24   : > { %s726_s7 = scalar_lea.hbm %s831_s1, %s398_s4  ;;  %s125_s8 = scalar_lea.vmem [#allocation5], %s397_s3 }
  0x25   : > { %s132_s14 = sshll.u32 %s125_s8, 4  ;;  %p728_p10 = pnand %p437_p0, %p56_p3  ;;  %s133_s14 = int_to_ptr.vmem [resolvable:$true] %s132_s14 }
  0x26   : > { %s122_s19 = scalar_lea.sflag [#allocation6], %s121_s30  ;;  %s509_s21 = scalar_lea.hbm %s726_s7, 128 }
  0x27   : > { %p510_p11 = scmp.ne.s32.totalorder %s726_s7, %s509_s21  ;;  %p511_p12 = pneg %p728_p10 }
  0x28   : > { %s514_s24 = scalar_lea.hbm %s831_s1, 512  ;;  %p515_p9 = scmp.lt.s32.totalorder %s726_s7, %s831_s1 }
  0x29   : > { %p512_p5 = pnand %p511_p12, %p510_p11  ;;  %p516_p1 = scmp.lt.s32.totalorder %s514_s24, %s509_s21 }
  0x2b   : > { %p513_p7 = pneg %p512_p5  ;;  %p517_p2 = por %p516_p1, %p515_p9 }
  0x2d   : > { %p518_p0 = pnand %p517_p2, %p513_p7 }
  0x2f   : > { %521 = shalt.err (!%p518_p0)
}
  0x30   : > { %s522_s27 = scalar_lea.vmem %s133_s14, 128  ;;  %s608_s30 = smov [#allocation5]  }
  0x31   : > { %p523_p3 = scmp.ne.s32.totalorder %s133_s14, %s522_s27  ;;  %s527_s3 = sshll.u32 %s608_s30, 4  ;;  %s528_s3 = int_to_ptr.vmem [resolvable:$false] %s527_s3 }
  0x32   : > { %s529_s4 = scalar_lea.vmem %s528_s3, 256  ;;  %p530_p11 = scmp.lt.s32.totalorder %s133_s14, %s528_s3 }
  0x33   : > { %p525_p6 = pnand %p523_p3, %p511_p12  ;;  %p531_p5 = scmp.lt.s32.totalorder %s529_s4, %s522_s27 }
  0x35   : > { %p526_p13 = pneg %p525_p6  ;;  %p532_p4 = por %p531_p5, %p530_p11 }
  0x37   : > { %p533_p8 = pnand %p532_p4, %p526_p13 }
  0x39   : > { %536 = shalt.err (!%p533_p8)
}
  0x3a   : > { %431 = dma.hbm_to_vmem [thread:$0]  (!%p728_p10), %s726_s7, 128, %s133_s14, %s122_s19  }
  0x3b   : > { %p845_p7 = scmp.ne.s32.totalorder %s839_s17, 0 }
  0x3c   : > { %p846_p9 = scmp.eq.s32.totalorder (!%p845_p7), %s652_s13, 0 }
  0x3d   : > { %141 = sbr.rel (%p845_p7) target bundleno = 181 (0xb5), region = 28 }
  0x42   : > { %580 = dma.done.wait (%p846_p9), [#allocation3], 32   ;;  %p847_p6 = pmov %p846_p9 }
  0x43   : > { %s753_s5 = sand.u32 1, %s597_s10   ;;  %p848_p4 = scmp.ne.s32.totalorder %s837_s15, 0 }
  0x44   : > { %582 = vsyncadd (%p847_p6), [#allocation3], 4294967264  ;;  %s401_s6 = sshll.u32 %s753_s5, 3  ;;  %s148_s8 = scalar_lea.sflag [#allocation6], %s753_s5 }
  0x45   : > { %s759_s7 = scalar_lea.vmem [#allocation5], %s401_s6 }
  0x46   : > { %584 = dma.done.wait (%p848_p4), %s148_s8, 128  }
  0x47   : > { %586 = vsyncadd (%p848_p4), %s148_s8, 4294967168  ;;  %v172_v0 = vlaneseq  ;;  %s403_s17 = sshll.u32 %s652_s13, 3  ;;  %v178_v7 = vld [vmem:[#allocation2] sm:$0x3]  ;;  %v609_v23 = vmov 683565275  }
  0x48   : > { %v175_v1 = vstv %s403_s17  ;;  %v610_v25 = vmov 2475754826   ;;  %v611_v27 = vmov 2131351028   ;;  %v612_v29 = vmov 2102212464  }
  0x49   : > { %v173_v2 = vshrl.u32 %v172_v0, 7  ;;  %v613_v31 = vmov 920167782   ;;  %v614_v38 = vmov 1326507024   ;;  %s171_s15 = scalar_lea.vmem [#allocation7], %s401_s6 }
  0x4a   : > { %s311_s14 = sshll.u32 %s171_s15, 4  ;;  %s409_s18 = sshll.u32 %s652_s13, 7  ;;  %vm295_vm13 = vcmask 523264   ;;  %s791_s14 = int_to_ptr.vmem [resolvable:$true] %s311_s14 }
  0x4b   : > { %v176_v3 = vadd.s32 %v175_v1, %v173_v2  ;;  %v181_v4 = vsub.s32 0, %v173_v2  ;;  %v186_v5 = vsub.s32 1, %v173_v2  ;;  %s309_s22 = scalar_lea.hbm %s832_s2, %s409_s18  ;;  %s298_s23 = scalar_lea.sflag [#allocation4], %s753_s5 }
  0x4c   : > { %s537_s24 = scalar_lea.vmem %s791_s14, 128  ;;  %p849_p13 = scmp.ne.s32.totalorder %s843_s29, 0 }
  0x4d   : > { %v177_v6 = vcvt.s32.f32 %v176_v3  ;;  %v182_v8 = vrot.slane %v178_v7, %v181_v4  ;;  %v187_v9 = vrot.slane %v178_v7, %v186_v5  ;;  %p538_p8 = scmp.ne.s32.totalorder %s791_s14, %s537_s24  ;;  %s615_s13 = smov [#allocation7]  }
  0x4e   : > { %s541_s25 = sshll.u32 %s615_s13, 4  ;;  %s542_s25 = int_to_ptr.vmem [resolvable:$false] %s541_s25 }
  0x4f   : > { %v183_v10 = vmul.f32 %v182_v8, %v177_v6  ;;  %p539_p10 = pnand %p538_p8, %p849_p13  ;;  %s543_s26 = scalar_lea.vmem %s542_s25, 256 }
  0x50   : > { %p544_p1 = scmp.lt.s32.totalorder %s791_s14, %s542_s25  ;;  %p545_p2 = scmp.lt.s32.totalorder %s543_s26, %s537_s24 }
  0x51   : > { %v766_v11 = vadd.f32 %v187_v9, %v183_v10  ;;  %p540_p12 = pneg %p539_p10 }
  0x52   : > { %p546_p0 = por %p545_p2, %p544_p1 }
  0x53   : > { %v192_v12 = vand.u32 2139095040, %v766_v11  ;;  %v189_v14 = vand.u32 2147483647, %v766_v11  ;;  %vm191_vm7 = vcmp.lt.s32.totalorder %v766_v11, 0  ;;  %vm281_vm12 = vweird.f32 %v766_v11 }
  0x54   : > { %p547_p3 = pnand %p546_p0, %p540_p12 }
  0x55   : > { %v193_v13 = vshrl.u32 %v192_v12, 23  ;;  %v196_v17 = vand.u32 8388607, %v189_v14  ;;  %vm190_vm8 = vcmp.le.f32.partialorder %v189_v14, 0.7853982 }
  0x57   : > { %v404_v15 = vadd.s32 4294967169, %v193_v13  ;;  %v197_v20 = vor.u32 8388608, %v196_v17 }
  0x59   : > { %v199_v16 = vadd.s32 1, %v404_v15  ;;  %v237_v40 = vshll.u32 %v197_v20, 8 }
  0x5b   : > { %vm200_vm0 = vcmp.gt.s32.totalorder %v199_v16, 0 }
  0x5c   : > { %v201_v18 = vsel %vm200_vm0, %v199_v16, 0 }
  0x5d   : > { %v203_v19 = vand.u32 31, %v201_v18  ;;  %v202_v21 = vshrl.u32 %v201_v18, 5 }
  0x5f   : > { %v204_v22 = vsub.s32 32, %v203_v19  ;;  %v206_v24 = vshll.u32 %v609_v23, %v203_v19  ;;  %v209_v26 = vshll.u32 %v610_v25, %v203_v19  ;;  %v212_v28 = vshll.u32 %v611_v27, %v203_v19 }
  0x60   : > { %v215_v30 = vshll.u32 %v612_v29, %v203_v19  ;;  %v218_v32 = vshll.u32 %v613_v31, %v203_v19  ;;  %vm221_vm1 = vcmp.lt.s32.totalorder %v202_v21, 1  ;;  %vm224_vm2 = vcmp.lt.s32.totalorder %v202_v21, 4 }
  0x61   : > { %v205_v33 = vshrl.u32 %v609_v23, %v204_v22  ;;  %v207_v34 = vshrl.u32 %v610_v25, %v204_v22  ;;  %v210_v35 = vshrl.u32 %v611_v27, %v204_v22  ;;  %v213_v36 = vshrl.u32 %v612_v29, %v204_v22 }
  0x62   : > { %v216_v37 = vshrl.u32 %v613_v31, %v204_v22  ;;  %v219_v39 = vshrl.u32 %v614_v38, %v204_v22  ;;  %vm222_vm3 = vcmp.lt.s32.totalorder %v202_v21, 2  ;;  %vm223_vm4 = vcmp.lt.s32.totalorder %v202_v21, 3  ;;  %v293_v38 = vld [vmem:[%s759_s7] sm:$0xff] }
  0x63   : > { %v208_v41 = vor.u32 %v207_v34, %v206_v24  ;;  %v211_v42 = vor.u32 %v210_v35, %v209_v26  ;;  %v214_v43 = vor.u32 %v213_v36, %v212_v28 }
  0x64   : > { %v217_v44 = vor.u32 %v216_v37, %v215_v30  ;;  %v220_v45 = vor.u32 %v219_v39, %v218_v32 }
  0x65   : > { %v225_v46 = vsel %vm221_vm1, %v205_v33, %v208_v41  ;;  %v226_v47 = vsel %vm224_vm2, %v214_v43, 2102212464  ;;  %v229_v48 = vsel %vm221_vm1, %v208_v41, %v211_v42  ;;  %v233_v49 = vsel %vm221_vm1, %v211_v42, %v214_v43 }
  0x66   : > { %v227_v50 = vsel %vm223_vm4, %v211_v42, %v226_v47  ;;  %v230_v51 = vsel %vm224_vm2, %v217_v44, 920167782  ;;  %v234_v52 = vsel %vm224_vm2, %v220_v45, 1326507024 }
  0x67   : > { %v231_v53 = vsel %vm223_vm4, %v214_v43, %v230_v51  ;;  %v235_v54 = vsel %vm223_vm4, %v217_v44, %v234_v52  ;;  %v228_v55 = vsel %vm222_vm3, %v225_v46, %v227_v50 }
  0x68   : > { %v232_v56 = vsel %vm222_vm3, %v229_v48, %v231_v53  ;;  %v236_v57 = vsel %vm222_vm3, %v233_v49, %v235_v54  ;;  %v244_v62 = vmul.u32 %v237_v40, %v228_v55 }
  0x69   : > { %v772_v58 = vmul.u32.u64.low %v237_v40, %v236_v57  ;;  %v773_v59 = vmul.u32.u64.high %v237_v40, %v236_v57, %v772_v58  ;;  %v775_v60 = vmul.u32.u64.low %v237_v40, %v232_v56  ;;  %v776_v61 = vmul.u32.u64.high %v237_v40, %v232_v56, %v775_v60 }
  0x6b   : > { %vm246_vm5 = vc.u32 %v773_v59, %v775_v60  ;;  %v247_v63 = vadd.s32 1, %v776_v61  ;;  %v245_v10 = vadd.s32 %v775_v60, %v773_v59 }
  0x6d   : > { %v248_v0 = vsel %vm246_vm5, %v247_v63, %v776_v61 }
  0x6e   : > { %v249_v1 = vadd.s32 %v248_v0, %v244_v62 }
  0x70   : > { %v250_v2 = vadd.s32 536870912, %v249_v1 }
  0x72   : > { %v251_v3 = vshrl.u32 %v250_v2, 30 }
  0x74   : > { %v252_v4 = vshll.u32 %v251_v3, 30  ;;  %v275_v25 = vsub.s32 4, %v251_v3 }
  0x76   : > { %v253_v5 = vsub.s32 %v249_v1, %v252_v4  ;;  %v276_v28 = vsel %vm191_vm7, %v275_v25, %v251_v3 }
  0x77   : > { %v278_v30 = vsel %vm190_vm8, 0, %v276_v28 }
  0x78   : > { %v255_v6 = vsub.s32 0, %v253_v5  ;;  %v282_v31 = vadd.s32 3, %v278_v30 }
  0x7a   : > { %v405_v7 = vmin.u32 %v255_v6, %v253_v5  ;;  %v283_v32 = vand.u32 3, %v282_v31 }
  0x7c   : > { %v257_v8 = vclz %v405_v7  ;;  %vm288_vm9 = vcmp.eq.s32.totalorder %v283_v32, 2  ;;  %vm285_vm10 = vcmp.eq.s32.totalorder %v283_v32, 0  ;;  %vm284_vm11 = vcmp.lt.s32.totalorder %v283_v32, 2 }
  0x7e   : > { %v406_v9 = vadd.s32 4294967294, %v257_v8 }
  0x80   : > { %vm407_vm6 = vcmp.lt.s32.totalorder %v406_v9, 0 }
  0x81   : > { %v260_v12 = vsel %vm407_vm6, 0, %v406_v9 }
  0x82   : > { %v261_v13 = vsub.s32 32, %v260_v12  ;;  %v262_v15 = vshll.u32 %v253_v5, %v260_v12  ;;  %v265_v16 = vsub.s32 4294967266, %v260_v12 }
  0x84   : > { %v263_v17 = vshrl.u32 %v245_v10, %v261_v13  ;;  %v266_v18 = vadd.s32 127, %v265_v16 }
  0x86   : > { %v264_v19 = vor.u32 %v263_v17, %v262_v15  ;;  %v267_v20 = vshll.u32 %v266_v18, 23 }
  0x88   : > { %v268_v21 = vor.u32 4788187, %v267_v20  ;;  %v271_v22 = vcvt.s32.f32 %v264_v19 }
  0x8a   : > { %v269_v23 = vand.u32 2147483647, %v268_v21 }
  0x8c   : > { %v272_v24 = vmul.f32 %v271_v22, %v269_v23 }
  0x8e   : > { %v273_v26 = vxor.u32 2147483648, %v272_v24 }
  0x90   : > { %v274_v27 = vsel %vm191_vm7, %v273_v26, %v272_v24 }
  0x91   : > { %v277_v29 = vsel %vm190_vm8, %v766_v11, %v274_v27 }
  0x92   : > { %479 = vcosq.f32 %v277_v29 }
  0x93   : > { %481 = vsinq.f32 %v277_v29 }
  0x9f   : > { %v480_v33 = vpop.eup %479 }
  0xa0   : > { %v482_v34 = vpop.eup %481  ;;  %v289_v35 = vxor.u32 2147483648, %v480_v33 }
  0xa1   : > { %v286_v14 = vxor.u32 2147483648, %v482_v34 }
  0xa2   : > { %v290_v36 = vsel %vm288_vm9, %v289_v35, %v482_v34 }
  0xa3   : > { %v287_v37 = vsel %vm285_vm10, %v480_v33, %v286_v14 }
  0xa4   : > { %v291_v39 = vsel %vm284_vm11, %v287_v37, %v290_v36 }
  0xa5   : > { %v292_v40 = vsel %vm281_vm12, nan, %v291_v39 }
  0xa6   : > { %v294_v41 = vadd.f32 %v293_v38, %v292_v40 }
  0xa8   : > { %296 = vst.msk [vmem:[%s171_s15] sm:$0xff] %vm295_vm13, %v294_v41 }
  0xa9   : > { %550 = shalt.err (!%p547_p3)
}
  0xaa   : > { %s551_s27 = scalar_lea.hbm %s309_s22, 128  ;;  %s555_s4 = scalar_lea.hbm %s832_s2, 512 }
  0xab   : > { %p552_p11 = scmp.ne.s32.totalorder %s309_s22, %s551_s27  ;;  %p556_p9 = scmp.lt.s32.totalorder %s309_s22, %s832_s2 }
  0xac   : > { %p557_p6 = scmp.lt.s32.totalorder %s555_s4, %s551_s27 }
  0xad   : > { %p553_p5 = pnand %p552_p11, %p849_p13 }
  0xae   : > { %p558_p4 = por %p557_p6, %p556_p9 }
  0xaf   : > { %p554_p7 = pneg %p553_p5 }
  0xb1   : > { %p559_p8 = pnand %p558_p4, %p554_p7 }
  0xb3   : > { %562 = shalt.err (!%p559_p8)
}
  0xb4   : > { %422 = dma.vmem_to_hbm [thread:$0]  (%p849_p13), %s791_s14, 128, %s309_s22, %s298_s23  }
  0xb5 PF: > { %p439_p10 = scmp.ge.s32.totalorder %s605_s12, 2  ;;  %s323_s8 = sand.u32 1, %s593_s9  }
  0xb6   : > { %p850_p12 = scmp.ne.s32.totalorder %s838_s16, 0  ;;  %s324_s7 = scalar_lea.sflag [#allocation4], %s323_s8 }
  0xb8   : > { %p433_p1 = pnand %p439_p10, %p850_p12 }
  0xba   : > { %p434_p2 = pneg %p433_p1 }
  0xbc   : > { %588 = dma.done.wait (%p434_p2), %s324_s7, 128  }
  0xbd   : > { %590 = vsyncadd (%p434_p2), %s324_s7, 4294967168  ;;  %p16_p0 = scmp.ge.s32.totalorder %s678_s20, 6   ;;  %s851_s9 = smov %s597_s10 }
  0xbe   : > { %s852_s10 = smov %s601_s11  ;;  %s853_s11 = smov %s705_s28 }
  0xbf   : > { %s854_s12 = smov %s678_s20  ;;  %18 = sbr.rel (!%p16_p0) target bundleno = 6 (0x6), region = 78 }
  0xc4   :  { %329 = vsyncpa [#allocation3], 1 }
  0xc5   :  { %331 = vsyncpa [#allocation3 + $0x1], 1 }
  0xc6   :  { %332 = vsyncpa [#allocation6], 1 }
  0xc7   :  { %334 = vsyncpa [#allocation6 + $0x1], 1 }
  0xc8   :  { %335 = vsyncpa [#allocation4], 1 }
  0xc9   :  { %337 = vsyncpa [#allocation4 + $0x1], 1 }

</bundles_post_ra>
